<compile_context>
chip_gen: v7x
topology: tpu7x:2x2x1
jax: 0.10.0
libtpu: 0.0.40
codegen_flags: <defaults>
</compile_context>

<pallas_src>
import functools

import numpy as np
import jax
import jax.numpy as jnp
from jax.experimental import pallas as pl
from jax.experimental.pallas import tpu as pltpu


# ---------------------------------------------------------------------------
# helpers
# ---------------------------------------------------------------------------

def _round_up(a, b):
    return (a + b - 1) // b * b


def _cdiv(a, b):
    return -(-a // b)


def _pick_tile(dim, target, step=128):
    """Largest tile <= target that divides dim (dim is a multiple of `step`)."""
    t = min(target, dim)
    while dim % t != 0:
        t -= step
    return t


@functools.lru_cache(maxsize=None)
def _vmem_capacity_bytes():
    """Physical per-core VMEM; conservative 64 MiB if the query fails."""
    try:
        info = pltpu.get_tpu_info()
        for attr in ("vmem_capacity_bytes", "vmem_size_bytes", "vmem_bytes"):
            v = getattr(info, attr, None)
            if v:
                return int(v)
    except Exception:
        pass
    return 64 << 20


def _vmem_limit_bytes():
    cap = _vmem_capacity_bytes()
    # Leave headroom for compiler-internal scratch / output staging:
    #   128 MiB (v5e/v6e) -> 104 MiB;  64 MiB (v7x) -> 48 MiB.
    return max(32 << 20, min(cap - (16 << 20), (cap * 13) // 16))


def _fused_budget_bytes():
    # ~78 MiB on v5e/v6e, ~36 MiB on v7x.
    return (_vmem_limit_bytes() * 3) // 4


def _fallback_tiles(vmem_limit):
    if vmem_limit >= (80 << 20):   # v5e / v6e (128 MiB physical VMEM)
        return 1024, 1024          # tn, tk
    return 512, 1024               # v7x (64 MiB physical VMEM)


# ---------------------------------------------------------------------------
# fused whole-MLP kernel (weights resident in VMEM, grid over row tiles)
# ---------------------------------------------------------------------------

def _mlp_fused_kernel(*refs, num_layers, compute_dtype):
    x_ref = refs[0]
    o_ref = refs[-1]
    wb_refs = refs[1:-1]          # (w0, b0, w1, b1, ..., w_{L-1}, b_{L-1})

    h = x_ref[...]                # already in compute_dtype
    for li in range(num_layers):
        w = wb_refs[2 * li][...]
        b = wb_refs[2 * li + 1][...]
        y = jnp.dot(h, w, preferred_element_type=jnp.float32)  # MXU, f32 acc
        y = y + b                                               # bias in f32
        if li < num_layers - 1:
            y = jnp.maximum(y, 0.0)                             # ReLU in f32
            h = y.astype(compute_dtype)                         # dropout = id (eval)
        else:
            o_ref[...] = y.astype(o_ref.dtype)


def _mlp_fused_call(hp, padded_layers, tm, Mp, Np_out, out_dtype, compute_dtype,
                    cost_estimate):
    num_layers = len(padded_layers)
    Kp0 = hp.shape[1]

    args = [hp]
    in_specs = [pl.BlockSpec((tm, Kp0), lambda i: (i, 0))]       # row tile of x
    for (wp, bp) in padded_layers:
        Kp, Np = wp.shape
        args += [wp, bp]
        # Constant index_map -> fetched once; Buffered(1) = single VMEM copy.
        in_specs += [
            pl.BlockSpec((Kp, Np), lambda i: (0, 0), pipeline_mode=pl.Buffered(1)),
            pl.BlockSpec((1, Np), lambda i: (0, 0), pipeline_mode=pl.Buffered(1)),
        ]

    return pl.pallas_call(
        functools.partial(_mlp_fused_kernel, num_layers=num_layers,
                          compute_dtype=compute_dtype),
        out_shape=jax.ShapeDtypeStruct((Mp, Np_out), out_dtype),
        grid=(Mp // tm,),
        in_specs=in_specs,
        out_specs=pl.BlockSpec((tm, Np_out), lambda i: (i, 0)),  # lane-dense output
        cost_estimate=cost_estimate,
        compiler_params=pltpu.CompilerParams(
            dimension_semantics=("parallel",),
            vmem_limit_bytes=_vmem_limit_bytes()),
    )(*args)


def _fused_weights_fit(padded_layers, tm, Kp0, Np_out, x_itemsize, out_itemsize,
                       budget_bytes):
    # Single-buffered resident weights (Buffered(1)) -> count weight bytes once.
    wbytes = sum(w.size * w.dtype.itemsize + b.size * b.dtype.itemsize
                 for (w, b) in padded_layers)
    widest = max([Kp0, Np_out] + [w.shape[1] for (w, _) in padded_layers])
    # Double-buffered x/out tiles + f32 intermediates / MXU staging.
    act_bytes = (2 * tm * Kp0 * x_itemsize
                 + 2 * tm * Np_out * out_itemsize
                 + 4 * tm * widest * 4)
    return wbytes + act_bytes <= budget_bytes


# ---------------------------------------------------------------------------
# fallback: per-layer M/N/K-tiled linear with f32 VMEM accumulator
# ---------------------------------------------------------------------------

def _linear_tiled_kernel(x_ref, w_ref, b_ref, o_ref, acc_ref, *, relu):
    k = pl.program_id(2)

    @pl.when(k == 0)
    def _init():
        acc_ref[...] = jnp.zeros_like(acc_ref)

    acc_ref[...] += jnp.dot(x_ref[...], w_ref[...],
                            preferred_element_type=jnp.float32)

    @pl.when(k == pl.num_programs(2) - 1)
    def _finish():
        y = acc_ref[...] + b_ref[...].astype(jnp.float32)
        if relu:
            y = jnp.maximum(y, 0.0)
        o_ref[...] = y.astype(o_ref.dtype)


def linear_pallas(x, w, b, *, relu, out_dtype, tm=512, tn=512, tk=1024):
    """y = x @ w + b (+ ReLU).  Expects padded, lane-dense operands:
    x: [M, K] with M % tm == 0, K % 128 == 0; w: [K, N], N % 128 == 0; b: [1, N]."""
    M, K = x.shape
    K2, N = w.shape
    assert K == K2 and b.shape == (1, N)
    assert M % tm == 0 and K % 128 == 0 and N % 128 == 0

    tn = _pick_tile(N, tn, 128)
    tk = _pick_tile(K, tk, 128)
    grid = (M // tm, N // tn, K // tk)

    cost = pl.CostEstimate(
        flops=int(2 * M * K * N),
        transcendentals=0,
        bytes_accessed=int(M * K * x.dtype.itemsize
                           + K * N * w.dtype.itemsize
                           + M * N * np.dtype(out_dtype).itemsize
                           + N * 4))

    return pl.pallas_call(
        functools.partial(_linear_tiled_kernel, relu=relu),
        out_shape=jax.ShapeDtypeStruct((M, N), out_dtype),
        grid=grid,
        in_specs=[
            pl.BlockSpec((tm, tk), lambda i, j, k: (i, k)),
            pl.BlockSpec((tk, tn), lambda i, j, k: (k, j)),
            pl.BlockSpec((1, tn), lambda i, j, k: (0, j)),
        ],
        out_specs=pl.BlockSpec((tm, tn), lambda i, j, k: (i, j)),
        scratch_shapes=[pltpu.VMEM((tm, tn), jnp.float32)],
        cost_estimate=cost,
        compiler_params=pltpu.CompilerParams(
            dimension_semantics=("parallel", "parallel", "arbitrary"),
            vmem_limit_bytes=_vmem_limit_bytes()),
    )(x, w, b)


# ---------------------------------------------------------------------------
# params (PyTorch-style Linear init; weight stored as [in, out])
# ---------------------------------------------------------------------------

def init_linear_params(key, in_features, out_features, dtype=jnp.float32):
    kw, kb = jax.random.split(key)
    bound = 1.0 / (in_features ** 0.5)
    w = jax.random.uniform(kw, (in_features, out_features), dtype, -bound, bound)
    b = jax.random.uniform(kb, (1, out_features), dtype, -bound, bound)
    return w, b


def init_mlp_params(key, input_size, output_size, mid_size=None, num_mid_layer=1):
    assert num_mid_layer >= 1
    if mid_size is None:
        mid_size = input_size
    keys = jax.random.split(key, num_mid_layer + 1)
    return {
        "input_fc": init_linear_params(keys[0], input_size, mid_size),
        "mid_fcs": [
            init_linear_params(keys[1 + i], mid_size, mid_size)
            for i in range(num_mid_layer - 1)
        ],
        "out_fc": init_linear_params(keys[num_mid_layer], mid_size, output_size),
    }


def prepare_mlp_params(params, compute_dtype=jnp.bfloat16):
    """Pad every layer's K/N to multiples of 128 and cast matmul operands ONCE.

    Do this at setup time; reusing the prepared dict across forward calls avoids
    an extra pad/cast pass over all weights per call."""
    layers = [params["input_fc"]] + list(params["mid_fcs"]) + [params["out_fc"]]
    padded = []
    for (w, b) in layers:
        K, N = w.shape
        Kp, Np = _round_up(K, 128), _round_up(N, 128)
        wp = jnp.pad(w, ((0, Kp - K), (0, Np - N))).astype(compute_dtype)
        bp = jnp.pad(jnp.reshape(b, (1, -1)), ((0, 0), (0, Np - N))).astype(jnp.float32)
        padded.append((wp, bp))
    return {
        "padded_layers": tuple(padded),
        "in_size": int(layers[0][0].shape[0]),
        "out_size": int(layers[-1][0].shape[1]),
        "compute_dtype": compute_dtype,
    }


# ---------------------------------------------------------------------------
# forward
# ---------------------------------------------------------------------------

def mlp_forward(params, x, *, tm=512, compute_dtype=jnp.bfloat16, fuse=True):
    """Forward pass matching MLP.forward (dropout = identity / eval mode).

    params: either raw params (init_mlp_params) or the dict from
            prepare_mlp_params (preferred: pad/cast happens once).
    x: [..., input_size] -> [..., output_size]
    compute_dtype: matmul operand dtype (bf16 fast path); accumulation is f32.
    """
    if isinstance(params, dict) and "padded_layers" in params:
        prepared = params
    else:
        prepared = prepare_mlp_params(params, compute_dtype=compute_dtype)
    padded = list(prepared["padded_layers"])
    compute_dtype = prepared["compute_dtype"]
    in_size = prepared["in_size"]
    out_size = prepared["out_size"]

    lead = x.shape[:-1]
    assert x.shape[-1] == in_size
    out_dtype = x.dtype
    h = x.reshape(-1, in_size)
    M = h.shape[0]

    Kp0 = padded[0][0].shape[0]
    Np_out = padded[-1][0].shape[1]

    # Row tile: multiple of 16 for bf16 (packed sublanes), 8 for f32.
    mult = 16 if np.dtype(compute_dtype).itemsize == 2 else 8
    tm_eff = _round_up(min(max(tm, mult), max(M, 1)), mult)
    # v7x megacore: keep >=2 row-grid steps (when M is big enough) so
    # dimension_semantics=("parallel",) shards across both TensorCores.
    min_tm = 128
    while tm_eff > min_tm and M > min_tm and _cdiv(M, tm_eff) < 2:
        tm_eff = max(min_tm, _round_up(tm_eff // 2, mult))
    Mp = _round_up(M, tm_eff)

    hp = jnp.pad(h, ((0, Mp - M), (0, Kp0 - in_size))).astype(compute_dtype)

    out_itemsize = np.dtype(out_dtype).itemsize
    x_itemsize = np.dtype(compute_dtype).itemsize
    cost = pl.CostEstimate(
        flops=int(2 * Mp * sum(w.shape[0] * w.shape[1] for w, _ in padded)),
        transcendentals=0,
        bytes_accessed=int(
            sum(w.size * w.dtype.itemsize + b.size * b.dtype.itemsize
                for w, b in padded)
            + Mp * Kp0 * x_itemsize + Mp * Np_out * out_itemsize))

    out_padded = None
    if fuse and _fused_weights_fit(padded, tm_eff, Kp0, Np_out,
                                   x_itemsize, out_itemsize,
                                   _fused_budget_bytes()):
        try:
            out_padded = _mlp_fused_call(hp, padded, tm_eff, Mp, Np_out,
                                         out_dtype, compute_dtype, cost)
        except Exception:
            out_padded = None   # fused lowering failed -> use tiled fallback

    if out_padded is None:
        tn, tk = _fallback_tiles(_vmem_limit_bytes())
        hcur = hp
        for li, (wp, bp) in enumerate(padded):
            last = li == len(padded) - 1
            hcur = linear_pallas(hcur, wp, bp, relu=not last,
                                 out_dtype=out_dtype if last else compute_dtype,
                                 tm=tm_eff, tn=tn, tk=tk)
        out_padded = hcur

    out = out_padded[:M, :out_size]
    return out.reshape(*lead, out_size)


def mlp_reference(params, x, compute_dtype=jnp.float32):
    """Pure-JAX reference (mirrors the kernel's casting for apples-to-apples)."""
    lead = x.shape[:-1]
    h = x.reshape(-1, x.shape[-1])
    layers = [params["input_fc"]] + list(params["mid_fcs"]) + [params["out_fc"]]
    for idx, (w, b) in enumerate(layers):
        y = jnp.dot(h.astype(compute_dtype), w.astype(compute_dtype),
                    preferred_element_type=jnp.float32) + b.astype(jnp.float32)
        if idx < len(layers) - 1:
            h = jnp.maximum(y, 0.0).astype(compute_dtype)
        else:
            h = y.astype(x.dtype)
    return h.reshape(*lead, h.shape[-1])


# ---------------------------------------------------------------------------
# smoke test
# ---------------------------------------------------------------------------

if __name__ == "__main__":
    batch, seq = 2, 8
    input_size, mid_size, output_size = 32, 64, 16
    num_mid_layer = 2  # exercises input_fc, one mid_fc, and out_fc

    key = jax.random.PRNGKey(0)
    kx, kp, kx2 = jax.random.split(key, 3)
    x = jax.random.normal(kx, (batch, seq, input_size), jnp.float32)
    params = init_mlp_params(kp, input_size, output_size,
                             mid_size=mid_size, num_mid_layer=num_mid_layer)

    # 1) fused kernel, default bf16 matmul operands (f32 accumulation/bias/ReLU);
    #    weights pre-padded/cast once.
    prepared_bf16 = prepare_mlp_params(params, compute_dtype=jnp.bfloat16)
    out_bf = jax.block_until_ready(mlp_forward(prepared_bf16, x))
    ref_bf = mlp_reference(params, x, compute_dtype=jnp.bfloat16)
    assert out_bf.shape == (batch, seq, output_size)
    assert jnp.allclose(out_bf, ref_bf, atol=2e-2, rtol=2e-2), "bf16 fused mismatch"

    # 2) fused kernel, f32 matmul operands
    prepared_f32 = prepare_mlp_params(params, compute_dtype=jnp.float32)
    out = jax.block_until_ready(mlp_forward(prepared_f32, x))
    ref = mlp_reference(params, x, compute_dtype=jnp.float32)
    assert jnp.allclose(out, ref, atol=1e-4, rtol=1e-4), "f32 fused mismatch"

    # 3) fallback tiled path + ragged row count (M=15 -> padded)
    x2 = jax.random.normal(kx2, (3, 5, input_size), jnp.float32)
    out2 = jax.block_until_ready(mlp_forward(prepared_f32, x2, fuse=False))
    ref2 = mlp_reference(params, x2, compute_dtype=jnp.float32)
    assert out2.shape == (3, 5, output_size)
    assert jnp.allclose(out2, ref2, atol=1e-4, rtol=1e-4), "tiled fallback mismatch"

    print("KERNEL_OK")
</pallas_src>

<mosaic_0001>
module attributes {stable_mosaic.version = 11 : i64} {
  func.func @_mlp_fused_kernel(%arg0: i32, %arg1: memref<16x128xbf16, #tpu.memory_space<vmem>>, %arg2: memref<128x128xbf16, #tpu.memory_space<vmem>>, %arg3: memref<1x128xf32, #tpu.memory_space<vmem>>, %arg4: memref<128x128xbf16, #tpu.memory_space<vmem>>, %arg5: memref<1x128xf32, #tpu.memory_space<vmem>>, %arg6: memref<128x128xbf16, #tpu.memory_space<vmem>>, %arg7: memref<1x128xf32, #tpu.memory_space<vmem>>, %arg8: memref<16x128xf32, #tpu.memory_space<vmem>>) attributes {dimension_semantics = [#tpu.dimension_semantics<parallel>], iteration_bounds = array<i64: 1>, scalar_prefetch = 0 : i64, scratch_operands = 0 : i64, tpu.core_type = #tpu.core_type<tc>, window_params = [{transform_indices = @transform_0, window_bounds = array<i64: 16, 128>}, {pipeline_mode = #tpu.pipeline_mode<synchronous>, transform_indices = @transform_1, window_bounds = array<i64: 128, 128>}, {pipeline_mode = #tpu.pipeline_mode<synchronous>, transform_indices = @transform_2, window_bounds = array<i64: 1, 128>}, {pipeline_mode = #tpu.pipeline_mode<synchronous>, transform_indices = @transform_3, window_bounds = array<i64: 128, 128>}, {pipeline_mode = #tpu.pipeline_mode<synchronous>, transform_indices = @transform_4, window_bounds = array<i64: 1, 128>}, {pipeline_mode = #tpu.pipeline_mode<synchronous>, transform_indices = @transform_5, window_bounds = array<i64: 128, 128>}, {pipeline_mode = #tpu.pipeline_mode<synchronous>, transform_indices = @transform_6, window_bounds = array<i64: 1, 128>}, {transform_indices = @transform_7, window_bounds = array<i64: 16, 128>}]} {
    %c0 = arith.constant 0 : index
    %c0_0 = arith.constant 0 : index
    %0 = vector.load %arg1[%c0, %c0_0] : memref<16x128xbf16, #tpu.memory_space<vmem>>, vector<16x128xbf16>
    %c0_1 = arith.constant 0 : index
    %c0_2 = arith.constant 0 : index
    %1 = vector.load %arg2[%c0_1, %c0_2] : memref<128x128xbf16, #tpu.memory_space<vmem>>, vector<128x128xbf16>
    %c0_3 = arith.constant 0 : index
    %c0_4 = arith.constant 0 : index
    %2 = vector.load %arg3[%c0_3, %c0_4] : memref<1x128xf32, #tpu.memory_space<vmem>>, vector<1x128xf32>
    %cst = arith.constant dense<0.000000e+00> : vector<16x128xf32>
    %3 = tpu.matmul %0, %1, %cst {dimension_numbers = #tpu.dot_dimension_numbers<[1], [0], [0], [1], [0, 0, 1, 1], [], []>} : vector<16x128xbf16>, vector<128x128xbf16>, vector<16x128xf32> -> vector<16x128xf32>
    %4 = vector.broadcast %2 : vector<1x128xf32> to vector<16x128xf32>
    %5 = arith.addf %3, %4 : vector<16x128xf32>
    %cst_5 = arith.constant 0.000000e+00 : f32
    %6 = vector.broadcast %cst_5 : f32 to vector<16x128xf32>
    %7 = arith.maximumf %5, %6 : vector<16x128xf32>
    %8 = arith.truncf %7 : vector<16x128xf32> to vector<16x128xbf16>
    %c0_6 = arith.constant 0 : index
    %c0_7 = arith.constant 0 : index
    %9 = vector.load %arg4[%c0_6, %c0_7] : memref<128x128xbf16, #tpu.memory_space<vmem>>, vector<128x128xbf16>
    %c0_8 = arith.constant 0 : index
    %c0_9 = arith.constant 0 : index
    %10 = vector.load %arg5[%c0_8, %c0_9] : memref<1x128xf32, #tpu.memory_space<vmem>>, vector<1x128xf32>
    %cst_10 = arith.constant dense<0.000000e+00> : vector<16x128xf32>
    %11 = tpu.matmul %8, %9, %cst_10 {dimension_numbers = #tpu.dot_dimension_numbers<[1], [0], [0], [1], [0, 0, 1, 1], [], []>} : vector<16x128xbf16>, vector<128x128xbf16>, vector<16x128xf32> -> vector<16x128xf32>
    %12 = vector.broadcast %10 : vector<1x128xf32> to vector<16x128xf32>
    %13 = arith.addf %11, %12 : vector<16x128xf32>
    %cst_11 = arith.constant 0.000000e+00 : f32
    %14 = vector.broadcast %cst_11 : f32 to vector<16x128xf32>
    %15 = arith.maximumf %13, %14 : vector<16x128xf32>
    %16 = arith.truncf %15 : vector<16x128xf32> to vector<16x128xbf16>
    %c0_12 = arith.constant 0 : index
    %c0_13 = arith.constant 0 : index
    %17 = vector.load %arg6[%c0_12, %c0_13] : memref<128x128xbf16, #tpu.memory_space<vmem>>, vector<128x128xbf16>
    %c0_14 = arith.constant 0 : index
    %c0_15 = arith.constant 0 : index
    %18 = vector.load %arg7[%c0_14, %c0_15] : memref<1x128xf32, #tpu.memory_space<vmem>>, vector<1x128xf32>
    %cst_16 = arith.constant dense<0.000000e+00> : vector<16x128xf32>
    %19 = tpu.matmul %16, %17, %cst_16 {dimension_numbers = #tpu.dot_dimension_numbers<[1], [0], [0], [1], [0, 0, 1, 1], [], []>} : vector<16x128xbf16>, vector<128x128xbf16>, vector<16x128xf32> -> vector<16x128xf32>
    %20 = vector.broadcast %18 : vector<1x128xf32> to vector<16x128xf32>
    %21 = arith.addf %19, %20 : vector<16x128xf32>
    %c0_17 = arith.constant 0 : index
    %c0_18 = arith.constant 0 : index
    %22 = vector.load %arg8[%c0_17, %c0_18] : memref<16x128xf32, #tpu.memory_space<vmem>>, vector<16x128xf32>
    tpu.vector_store %arg8[%c0_17, %c0_18], %21 {strides = array<i32>} : memref<16x128xf32, #tpu.memory_space<vmem>>, vector<16x128xf32>,
    return
  }
  func.func @transform_0(%arg0: i32) -> (i32, i32) {
    %c0_i32 = arith.constant 0 : i32
    %c0_i32_0 = arith.constant 0 : i32
    return %arg0, %c0_i32 : i32, i32
  }
  func.func @transform_1(%arg0: i32) -> (i32, i32) {
    %c0_i32 = arith.constant 0 : i32
    %c0_i32_0 = arith.constant 0 : i32
    %c0_i32_1 = arith.constant 0 : i32
    return %c0_i32, %c0_i32_0 : i32, i32
  }
  func.func @transform_2(%arg0: i32) -> (i32, i32) {
    %c0_i32 = arith.constant 0 : i32
    %c0_i32_0 = arith.constant 0 : i32
    %c0_i32_1 = arith.constant 0 : i32
    return %c0_i32, %c0_i32_0 : i32, i32
  }
  func.func @transform_3(%arg0: i32) -> (i32, i32) {
    %c0_i32 = arith.constant 0 : i32
    %c0_i32_0 = arith.constant 0 : i32
    %c0_i32_1 = arith.constant 0 : i32
    return %c0_i32, %c0_i32_0 : i32, i32
  }
  func.func @transform_4(%arg0: i32) -> (i32, i32) {
    %c0_i32 = arith.constant 0 : i32
    %c0_i32_0 = arith.constant 0 : i32
    %c0_i32_1 = arith.constant 0 : i32
    return %c0_i32, %c0_i32_0 : i32, i32
  }
  func.func @transform_5(%arg0: i32) -> (i32, i32) {
    %c0_i32 = arith.constant 0 : i32
    %c0_i32_0 = arith.constant 0 : i32
    %c0_i32_1 = arith.constant 0 : i32
    return %c0_i32, %c0_i32_0 : i32, i32
  }
  func.func @transform_6(%arg0: i32) -> (i32, i32) {
    %c0_i32 = arith.constant 0 : i32
    %c0_i32_0 = arith.constant 0 : i32
    %c0_i32_1 = arith.constant 0 : i32
    return %c0_i32, %c0_i32_0 : i32, i32
  }
  func.func @transform_7(%arg0: i32) -> (i32, i32) {
    %c0_i32 = arith.constant 0 : i32
    %c0_i32_0 = arith.constant 0 : i32
    return %arg0, %c0_i32 : i32, i32
  }
}

module attributes {stable_mosaic.version = 11 : i64} {
  func.func @_linear_tiled_kernel(%arg0: i32, %arg1: i32, %arg2: i32, %arg3: memref<16x128xbf16, #tpu.memory_space<vmem>>, %arg4: memref<128x128xbf16, #tpu.memory_space<vmem>>, %arg5: memref<1x128xf32, #tpu.memory_space<vmem>>, %arg6: memref<16x128xbf16, #tpu.memory_space<vmem>>, %arg7: memref<16x128xf32, #tpu.memory_space<vmem>>) attributes {dimension_semantics = [#tpu.dimension_semantics<parallel>, #tpu.dimension_semantics<parallel>, #tpu.dimension_semantics<arbitrary>], iteration_bounds = array<i64: 1, 1, 1>, scalar_prefetch = 0 : i64, scratch_operands = 1 : i64, tpu.core_type = #tpu.core_type<tc>, window_params = [{transform_indices = @transform_0, window_bounds = array<i64: 16, 128>}, {transform_indices = @transform_1, window_bounds = array<i64: 128, 128>}, {transform_indices = @transform_2, window_bounds = array<i64: 1, 128>}, {transform_indices = @transform_3, window_bounds = array<i64: 16, 128>}]} {
    %c0_i32 = arith.constant 0 : i32
    %0 = arith.cmpi eq, %arg2, %c0_i32 : i32
    %1 = arith.extui %0 : i1 to i32
    %c0_i32_0 = arith.constant 0 : i32
    %2 = arith.cmpi ne, %1, %c0_i32_0 : i32
    scf.if %2 {
      %cst_10 = arith.constant 0.000000e+00 : f32
      %12 = vector.broadcast %cst_10 : f32 to vector<16x128xf32>
      %c0_11 = arith.constant 0 : index
      %c0_12 = arith.constant 0 : index
      %13 = vector.load %arg7[%c0_11, %c0_12] : memref<16x128xf32, #tpu.memory_space<vmem>>, vector<16x128xf32>
      tpu.vector_store %arg7[%c0_11, %c0_12], %12 {strides = array<i32>} : memref<16x128xf32, #tpu.memory_space<vmem>>, vector<16x128xf32>,
    } else {
    }
    %c0 = arith.constant 0 : index
    %c0_1 = arith.constant 0 : index
    %3 = vector.load %arg7[%c0, %c0_1] : memref<16x128xf32, #tpu.memory_space<vmem>>, vector<16x128xf32>
    %c0_2 = arith.constant 0 : index
    %c0_3 = arith.constant 0 : index
    %4 = vector.load %arg3[%c0_2, %c0_3] : memref<16x128xbf16, #tpu.memory_space<vmem>>, vector<16x128xbf16>
    %c0_4 = arith.constant 0 : index
    %c0_5 = arith.constant 0 : index
    %5 = vector.load %arg4[%c0_4, %c0_5] : memref<128x128xbf16, #tpu.memory_space<vmem>>, vector<128x128xbf16>
    %cst = arith.constant dense<0.000000e+00> : vector<16x128xf32>
    %6 = tpu.matmul %4, %5, %cst {dimension_numbers = #tpu.dot_dimension_numbers<[1], [0], [0], [1], [0, 0, 1, 1], [], []>} : vector<16x128xbf16>, vector<128x128xbf16>, vector<16x128xf32> -> vector<16x128xf32>
    %7 = arith.addf %3, %6 : vector<16x128xf32>
    %c0_6 = arith.constant 0 : index
    %c0_7 = arith.constant 0 : index
    %8 = vector.load %arg7[%c0_6, %c0_7] : memref<16x128xf32, #tpu.memory_space<vmem>>, vector<16x128xf32>
    tpu.vector_store %arg7[%c0_6, %c0_7], %7 {strides = array<i32>} : memref<16x128xf32, #tpu.memory_space<vmem>>, vector<16x128xf32>,
    %c0_i32_8 = arith.constant 0 : i32
    %9 = arith.cmpi eq, %arg2, %c0_i32_8 : i32
    %10 = arith.extui %9 : i1 to i32
    %c0_i32_9 = arith.constant 0 : i32
    %11 = arith.cmpi ne, %10, %c0_i32_9 : i32
    scf.if %11 {
      %c0_10 = arith.constant 0 : index
      %c0_11 = arith.constant 0 : index
      %12 = vector.load %arg7[%c0_10, %c0_11] : memref<16x128xf32, #tpu.memory_space<vmem>>, vector<16x128xf32>
      %c0_12 = arith.constant 0 : index
      %c0_13 = arith.constant 0 : index
      %13 = vector.load %arg5[%c0_12, %c0_13] : memref<1x128xf32, #tpu.memory_space<vmem>>, vector<1x128xf32>
      %14 = vector.broadcast %13 : vector<1x128xf32> to vector<16x128xf32>
      %15 = arith.addf %12, %14 : vector<16x128xf32>
      %cst_14 = arith.constant 0.000000e+00 : f32
      %16 = vector.broadcast %cst_14 : f32 to vector<16x128xf32>
      %17 = arith.maximumf %15, %16 : vector<16x128xf32>
      %18 = arith.truncf %17 : vector<16x128xf32> to vector<16x128xbf16>
      %c0_15 = arith.constant 0 : index
      %c0_16 = arith.constant 0 : index
      %19 = vector.load %arg6[%c0_15, %c0_16] : memref<16x128xbf16, #tpu.memory_space<vmem>>, vector<16x128xbf16>
      tpu.vector_store %arg6[%c0_15, %c0_16], %18 {strides = array<i32>} : memref<16x128xbf16, #tpu.memory_space<vmem>>, vector<16x128xbf16>,
    } else {
    }
    return
  }
  func.func @transform_0(%arg0: i32, %arg1: i32, %arg2: i32) -> (i32, i32) {
    %c0_i32 = arith.constant 0 : i32
    return %arg0, %arg2 : i32, i32
  }
  func.func @transform_1(%arg0: i32, %arg1: i32, %arg2: i32) -> (i32, i32) {
    %c0_i32 = arith.constant 0 : i32
    return %arg2, %arg1 : i32, i32
  }
  func.func @transform_2(%arg0: i32, %arg1: i32, %arg2: i32) -> (i32, i32) {
    %c0_i32 = arith.constant 0 : i32
    %c0_i32_0 = arith.constant 0 : i32
    return %c0_i32, %arg1 : i32, i32
  }
  func.func @transform_3(%arg0: i32, %arg1: i32, %arg2: i32) -> (i32, i32) {
    %c0_i32 = arith.constant 0 : i32
    return %arg0, %arg1 : i32, i32
  }
}

</mosaic_0001>

<bundles_post_ra>
// kernel: tpu_custom_call.1
= control target key start
LH: loop header
LB: loop body
LE: loop exit
PB: predicated region body
PF: predicated region fallthrough
CT: control target
= control target key end

     0   :  { %12 = vsyncpa [#allocation3], 0  ;;  %s899_s0 = inlined_call_operand.hbm [shape: bf16[16,128], index: 0, kind: input, shape index: {}]   ;;  %s900_s1 = inlined_call_operand.hbm [shape: bf16[128,128], index: 1, kind: input, shape index: {}]   ;;  %s901_s2 = inlined_call_operand.vmem [shape: f32[1,128], index: 2, kind: input, shape index: {}]   ;;  %s902_s3 = inlined_call_operand.hbm [shape: bf16[128,128], index: 3, kind: input, shape index: {}]   ;;  %s903_s4 = inlined_call_operand.vmem [shape: f32[1,128], index: 4, kind: input, shape index: {}]   ;;  %s904_s5 = inlined_call_operand.hbm [shape: bf16[128,128], index: 5, kind: input, shape index: {}]   ;;  %s905_s6 = inlined_call_operand.vmem [shape: f32[1,128], index: 6, kind: input, shape index: {}]   ;;  %s906_s7 = inlined_call_operand.hbm [shape: f32[16,128], index: 7, kind: output, shape index: {}]  }
   0x1   :  { %13 = vsyncpa [#allocation6], 0 }
   0x2   :  { %14 = vsyncpa [#allocation9], 0 }
   0x3   :  { %15 = vsyncpa [#allocation4], 0  ;;  %s723_s24 = smov [#allocation5]   ;;  %s724_s26 = smov [#allocation2]  }
   0x4   :  { %s33_s25 = sshll.u32 %s723_s24, 4  ;;  %s21_s27 = sshll.u32 %s724_s26, 4  ;;  %s34_s25 = int_to_ptr.vmem [resolvable:$true] %s33_s25  ;;  %s774_s27 = int_to_ptr.vmem [resolvable:$true] %s21_s27 }
   0x5   :  { %s605_s30 = scalar_lea.hbm %s900_s1, 1024 }
   0x6   :  { %p606_p0 = scmp.ne.s32.totalorder %s900_s1, %s605_s30  ;;  %p609_p1 = scmp.lt.u32.totalorder %s605_s30, %s900_s1 }
   0x8   :  { %p611_p2 = pnand %p609_p1, %p606_p0 }
   0xa   :  { %614 = shalt.err (!%p611_p2)
}
   0xb   :  { %s615_s12 = scalar_lea.vmem %s34_s25, 1024  ;;  %p620_p4 = scmp.lt.s32.totalorder %s34_s25, %s34_s25 }
   0xc   :  { %p616_p3 = scmp.ne.s32.totalorder %s34_s25, %s615_s12  ;;  %p621_p5 = scmp.lt.s32.totalorder %s615_s12, %s615_s12 }
   0xe   :  { %p622_p6 = por %p621_p5, %p620_p4 }
  0x10   :  { %p623_p7 = pnand %p622_p6, %p616_p3 }
  0x12   :  { %626 = shalt.err (!%p623_p7)
}
  0x13   :  { %s725_s13 = smov 64   ;;  %s726_s14 = smov 4  }
  0x14   :  { %39 = dma.hbm_to_vmem [thread:$0]  %s900_s1, 1024, %s34_s25, [#allocation6], %s725_s13, %s725_s13, %s726_s14  }
  0x15   :  { %s627_s19 = scalar_lea.hbm %s899_s0, 128 }
  0x16   :  { %p628_p8 = scmp.ne.s32.totalorder %s899_s0, %s627_s19  ;;  %p631_p9 = scmp.lt.u32.totalorder %s627_s19, %s899_s0 }
  0x18   :  { %p633_p10 = pnand %p631_p9, %p628_p8 }
  0x1a   :  { %636 = shalt.err (!%p633_p10)
}
  0x1b   :  { %s637_s24 = scalar_lea.vmem %s774_s27, 128  ;;  %p642_p12 = scmp.lt.s32.totalorder %s774_s27, %s774_s27 }
  0x1c   :  { %p638_p11 = scmp.ne.s32.totalorder %s774_s27, %s637_s24  ;;  %p643_p13 = scmp.lt.s32.totalorder %s637_s24, %s637_s24 }
  0x1e   :  { %p644_p0 = por %p643_p13, %p642_p12 }
  0x20   :  { %p645_p1 = pnand %p644_p0, %p638_p11 }
  0x22   :  { %648 = shalt.err (!%p645_p1)
}
  0x23   :  { %27 = dma.hbm_to_vmem [thread:$0]  %s899_s0, 128, %s774_s27, [#allocation3], %s725_s13, %s725_s13, %s726_s14  }
  0x24   :  { %s727_s26 = smov [#allocation7]   ;;  %s728_s29 = smov [#allocation8]  }
  0x25   :  { %s47_s28 = sshll.u32 %s727_s26, 4  ;;  %s61_s30 = sshll.u32 %s728_s29, 4  ;;  %s48_s28 = int_to_ptr.vmem [resolvable:$true] %s47_s28  ;;  %s811_s30 = int_to_ptr.vmem [resolvable:$true] %s61_s30 }
  0x26   :  { %s649_s10 = scalar_lea.hbm %s902_s3, 1024 }
  0x27   :  { %p650_p2 = scmp.ne.s32.totalorder %s902_s3, %s649_s10  ;;  %p653_p3 = scmp.lt.u32.totalorder %s649_s10, %s902_s3 }
  0x29   :  { %p655_p4 = pnand %p653_p3, %p650_p2 }
  0x2b   :  { %658 = shalt.err (!%p655_p4)
}
  0x2c   :  { %s659_s0 = scalar_lea.vmem %s48_s28, 1024  ;;  %p664_p6 = scmp.lt.s32.totalorder %s48_s28, %s48_s28 }
  0x2d   :  { %p660_p5 = scmp.ne.s32.totalorder %s48_s28, %s659_s0  ;;  %p665_p7 = scmp.lt.s32.totalorder %s659_s0, %s659_s0 }
  0x2f   :  { %p666_p8 = por %p665_p7, %p664_p6 }
  0x31   :  { %p667_p9 = pnand %p666_p8, %p660_p5 }
  0x33   :  { %670 = shalt.err (!%p667_p9)
}
  0x34   :  { %53 = dma.hbm_to_vmem [thread:$0]  %s902_s3, 1024, %s48_s28, [#allocation6], %s725_s13, %s725_s13, %s726_s14  }
  0x35   :  { %s671_s20 = scalar_lea.hbm %s904_s5, 1024 }
  0x36   :  { %p672_p10 = scmp.ne.s32.totalorder %s904_s5, %s671_s20  ;;  %p675_p11 = scmp.lt.u32.totalorder %s671_s20, %s904_s5 }
  0x38   :  { %p677_p12 = pnand %p675_p11, %p672_p10 }
  0x3a   :  { %680 = shalt.err (!%p677_p12)
}
  0x3b   :  { %s681_s1 = scalar_lea.vmem %s811_s30, 1024  ;;  %p686_p0 = scmp.lt.s32.totalorder %s811_s30, %s811_s30 }
  0x3c   :  { %p682_p13 = scmp.ne.s32.totalorder %s811_s30, %s681_s1  ;;  %p687_p1 = scmp.lt.s32.totalorder %s681_s1, %s681_s1 }
  0x3e   :  { %p688_p2 = por %p687_p1, %p686_p0 }
  0x40   :  { %p689_p3 = pnand %p688_p2, %p682_p13 }
  0x42   :  { %692 = shalt.err (!%p689_p3)
}
  0x43   :  { %67 = dma.hbm_to_vmem [thread:$0]  %s904_s5, 1024, %s811_s30, [#allocation9], %s725_s13, %s725_s13, %s726_s14  }
  0x44   :  { %715 = dma.done.wait [#allocation3], 128  }
  0x45   :  { %716 = vsyncadd [#allocation3], 4294967168 }
  0x46   :  { %717 = dma.done.wait [#allocation6], 2048  }
  0x47   :  { %718 = vsyncadd [#allocation6], 4294965248 }
  0x48   :  { %719 = dma.done.wait [#allocation9], 1024  }
  0x49   :  { %720 = vsyncadd [#allocation9], 4294966272  ;;  %v729_v0 = vmov 0.0   ;;  %vm730_vm0 = vmmov 0   ;;  %v580_v1 = vld [vmem:[#allocation5] sm:$0xff]   ;;  %v581_v2 = vld [vmem:[#allocation5 + $0x8] sm:$0xff]  }
  0x4a   :  { %509 = vmatprep.subr.bf16.mxu0 %v729_v0  ;;  %525 = vmatprep.mubr.msk.bf16.mxu0 %vm730_vm0, %v729_v0  ;;  %v582_v3 = vld [vmem:[#allocation5 + $0x10] sm:$0xff]   ;;  %v589_v4 = vld [vmem:[#allocation7] sm:$0xff]   ;;  %v583_v5 = vld [vmem:[#allocation5 + $0x18] sm:$0xff]   ;;  %s731_s29 = smov [#allocation10]  }
  0x4b   :  { %529 = vmatprep.subr.bf16.mxu1 %v729_v0  ;;  %545 = vmatprep.mubr.msk.bf16.mxu1 %vm730_vm0, %v729_v0  ;;  %v590_v6 = vld [vmem:[#allocation7 + $0x8] sm:$0xff]   ;;  %v584_v7 = vld [vmem:[#allocation5 + $0x20] sm:$0xff]   ;;  %v591_v8 = vld [vmem:[#allocation7 + $0x10] sm:$0xff]   ;;  %s440_s30 = sshll.u32 %s731_s29, 4  ;;  %s441_s30 = int_to_ptr.vmem [resolvable:$true] %s440_s30 }
  0x4c   :  { %510 = vmatpush3.bf16.msra.mxu0 %v580_v1  ;;  %530 = vmatpush3.bf16.msra.mxu1 %v589_v4  ;;  %v585_v9 = vld [vmem:[#allocation5 + $0x28] sm:$0xff]   ;;  %v592_v10 = vld [vmem:[#allocation7 + $0x18] sm:$0xff]   ;;  %v586_v11 = vld [vmem:[#allocation5 + $0x30] sm:$0xff]   ;;  %p698_p5 = scmp.lt.s32.totalorder %s441_s30, %s441_s30 }
  0x4d   :  { %511 = vmatprep.subr.bf16.mxu0 %v729_v0  ;;  %531 = vmatprep.subr.bf16.mxu1 %v729_v0  ;;  %v593_v12 = vld [vmem:[#allocation7 + $0x20] sm:$0xff]   ;;  %v587_v13 = vld [vmem:[#allocation5 + $0x38] sm:$0xff]   ;;  %v594_v14 = vld [vmem:[#allocation7 + $0x28] sm:$0xff]  }
  0x4e   :  { %v588_v15 = vld [vmem:[#allocation2] sm:$0xff]   ;;  %v595_v16 = vld [vmem:[#allocation7 + $0x30] sm:$0xff]   ;;  %v597_v18 = vld [vmem:[#allocation8] sm:$0xff]  }
  0x4f   :  { %v596_v17 = vld [vmem:[#allocation7 + $0x38] sm:$0xff]   ;;  %v598_v19 = vld [vmem:[#allocation8 + $0x8] sm:$0xff]   ;;  %v599_v20 = vld [vmem:[#allocation8 + $0x10] sm:$0xff]  }
  0x50   :  { %512 = vmatpush3.bf16.msra.mxu0 %v581_v2  ;;  %532 = vmatpush3.bf16.msra.mxu1 %v590_v6  ;;  %v600_v21 = vld [vmem:[#allocation8 + $0x18] sm:$0xff]   ;;  %v601_v22 = vld [vmem:[#allocation8 + $0x20] sm:$0xff]   ;;  %v602_v23 = vld [vmem:[#allocation8 + $0x28] sm:$0xff]  }
  0x51   :  { %513 = vmatprep.subr.bf16.mxu0 %v729_v0  ;;  %533 = vmatprep.subr.bf16.mxu1 %v729_v0  ;;  %v454_v24 = vld [vmem:[%s901_s2] ss:$0 sm:$0xff]  ;;  %v603_v34 = vld [vmem:[#allocation8 + $0x30] sm:$0xff]  }
  0x52   :  { %v604_v35 = vld [vmem:[#allocation8 + $0x38] sm:$0xff]  }
  0x53   :  { %v464_v36 = vld [vmem:[%s903_s4] ss:$0 sm:$0xff]  ;;  %s693_s4 = scalar_lea.vmem %s441_s30, 256 }
  0x54   :  { %514 = vmatpush3.bf16.msra.mxu0 %v582_v3  ;;  %534 = vmatpush3.bf16.msra.mxu1 %v591_v8  ;;  %v473_v46 = vld [vmem:[%s905_s6] ss:$0 sm:$0xff]  ;;  %p694_p4 = scmp.ne.s32.totalorder %s441_s30, %s693_s4  ;;  %p699_p6 = scmp.lt.s32.totalorder %s693_s4, %s693_s4 }
  0x55   :  { %515 = vmatprep.subr.bf16.mxu0 %v729_v0  ;;  %535 = vmatprep.subr.bf16.mxu1 %v729_v0 }
  0x56   :  { %p700_p7 = por %p699_p6, %p698_p5 }
  0x58   :  { %516 = vmatpush3.bf16.msra.mxu0 %v583_v5  ;;  %536 = vmatpush3.bf16.msra.mxu1 %v592_v10  ;;  %p701_p8 = pnand %p700_p7, %p694_p4 }
  0x59   :  { %517 = vmatprep.subr.bf16.mxu0 %v729_v0  ;;  %537 = vmatprep.subr.bf16.mxu1 %v729_v0 }
  0x5c   :  { %518 = vmatpush3.bf16.msra.mxu0 %v584_v7  ;;  %538 = vmatpush3.bf16.msra.mxu1 %v593_v12 }
  0x5d   :  { %519 = vmatprep.subr.bf16.mxu0 %v729_v0  ;;  %539 = vmatprep.subr.bf16.mxu1 %v729_v0 }
  0x60   :  { %520 = vmatpush3.bf16.msra.mxu0 %v585_v9  ;;  %540 = vmatpush3.bf16.msra.mxu1 %v594_v14 }
  0x61   :  { %521 = vmatprep.subr.bf16.mxu0 %v729_v0  ;;  %541 = vmatprep.subr.bf16.mxu1 %v729_v0 }
  0x64   :  { %522 = vmatpush3.bf16.msra.mxu0 %v586_v11  ;;  %542 = vmatpush3.bf16.msra.mxu1 %v595_v16 }
  0x65   :  { %523 = vmatprep.subr.bf16.mxu0 %v729_v0  ;;  %543 = vmatprep.subr.bf16.mxu1 %v729_v0 }
  0x68   :  { %524 = vmatpush3.bf16.msra.mxu0 %v587_v13  ;;  %544 = vmatpush3.bf16.msra.mxu1 %v596_v17 }
  0x69   :  { %549 = vmatprep.subr.bf16.mxu0 %v729_v0 }
  0x6b   :  { %526 = vmatmul.mubr.bf16.vlgmr.msra.gmra.mrb[0].mxu0 %v588_v15 }
  0x6c   :  { %565 = vmatprep.mubr.msk.bf16.mxu0 %vm730_vm0, %v729_v0  ;;  %550 = vmatpush3.bf16.msra.mxu0 %v597_v18 }
  0x6d   :  { %551 = vmatprep.subr.bf16.mxu0 %v729_v0 }
  0x70   :  { %552 = vmatpush3.bf16.msra.mxu0 %v598_v19 }
  0x71   :  { %553 = vmatprep.subr.bf16.mxu0 %v729_v0 }
  0x74   :  { %554 = vmatpush3.bf16.msra.mxu0 %v599_v20 }
  0x75   :  { %555 = vmatprep.subr.bf16.mxu0 %v729_v0 }
  0x78   :  { %556 = vmatpush3.bf16.msra.mxu0 %v600_v21 }
  0x79   :  { %557 = vmatprep.subr.bf16.mxu0 %v729_v0 }
  0x7c   :  { %558 = vmatpush3.bf16.msra.mxu0 %v601_v22 }
  0x7d   :  { %559 = vmatprep.subr.bf16.mxu0 %v729_v0 }
  0x80   :  { %560 = vmatpush3.bf16.msra.mxu0 %v602_v23 }
  0x81   :  { %561 = vmatprep.subr.bf16.mxu0 %v729_v0 }
  0x84   :  { %562 = vmatpush3.bf16.msra.mxu0 %v603_v34 }
  0x85   :  { %563 = vmatprep.subr.bf16.mxu0 %v729_v0 }
  0x88   :  { %564 = vmatpush3.bf16.msra.mxu0 %v604_v35 }
 0x13e   :  { %v196_v25 = vpop.f32.mrb[0].mxu0 }
 0x13f   :  { %v197_v26 = vadd.f32 %v454_v24, %v196_v25  ;;  %v527_v27 = vpop.f32.mrb[1].mxu0 }
 0x140   :  { %v199_v28 = vpop.f32.mrb[2].mxu0 }
 0x141   :  { %v200_v29 = vadd.f32 %v454_v24, %v199_v28  ;;  %v528_v30 = vpop.f32.mrb[3].mxu0  ;;  %v203_v31 = vmax.f32 %v197_v26, 0.0 }
 0x143   :  { %v204_v32 = vmax.f32 %v200_v29, 0.0 }
 0x145   :  { %v205_v33 = vpack.c.bf16 %v204_v32, %v203_v31 }
 0x147   :  { %546 = vmatmul.mubr.bf16.vlgmr.msra.gmra.mrb[0].mxu1 %v205_v33 }
 0x21a   :  { %v311_v37 = vpop.f32.mrb[0].mxu1 }
 0x21b   :  { %v312_v38 = vadd.f32 %v464_v36, %v311_v37  ;;  %v547_v39 = vpop.f32.mrb[1].mxu1 }
 0x21c   :  { %v314_v40 = vpop.f32.mrb[2].mxu1 }
 0x21d   :  { %v315_v41 = vadd.f32 %v464_v36, %v314_v40  ;;  %v548_v42 = vpop.f32.mrb[3].mxu1  ;;  %v318_v43 = vmax.f32 %v312_v38, 0.0 }
 0x21f   :  { %v319_v44 = vmax.f32 %v315_v41, 0.0 }
 0x221   :  { %v320_v45 = vpack.c.bf16 %v319_v44, %v318_v43 }
 0x223   :  { %566 = vmatmul.mubr.bf16.vlgmr.msra.gmra.mrb[4].mxu0 %v320_v45 }
 0x2f6   :  { %v426_v47 = vpop.f32.mrb[4].mxu0 }
 0x2f7   :  { %v427_v48 = vadd.f32 %v473_v46, %v426_v47  ;;  %v567_v49 = vpop.f32.mrb[5].mxu0 }
 0x2f8   :  { %v429_v50 = vpop.f32.mrb[6].mxu0 }
 0x2f9   :  { %433 = vst [vmem:[#allocation10] sm:$0xff] %v427_v48  ;;  %v430_v51 = vadd.f32 %v473_v46, %v429_v50  ;;  %v568_v52 = vpop.f32.mrb[7].mxu0 }
 0x2fb   :  { %434 = vst [vmem:[#allocation10 + $0x8] sm:$0xff] %v430_v51 }
 0x2fc   :  { %704 = shalt.err (!%p701_p8)
}
 0x2fd   :  { %s705_s9 = scalar_lea.hbm %s906_s7, 256 }
 0x2fe   :  { %p706_p9 = scmp.ne.s32.totalorder %s906_s7, %s705_s9  ;;  %p709_p10 = scmp.lt.u32.totalorder %s705_s9, %s906_s7 }
 0x300   :  { %p711_p11 = pnand %p709_p10, %p706_p9 }
 0x302   :  { %714 = shalt.err (!%p711_p11)
}
 0x303   :  { %s732_s16 = smov 128   ;;  %s733_s0 = smov 8  }
 0x304   :  { %446 = dma.vmem_to_hbm [thread:$0]  %s441_s30, 256, %s906_s7, [#allocation4], %s732_s16, %s732_s16, %s733_s0  }
 0x305   :  { %721 = dma.done.wait [#allocation4], 256  }
 0x306   :  { %722 = vsyncadd [#allocation4], 4294967040 }
 0x307   :  { %450 = vsyncpa [#allocation3], 1 }
 0x308   :  { %451 = vsyncpa [#allocation6], 1 }
 0x309   :  { %452 = vsyncpa [#allocation9], 1 }
 0x30a   :  { %453 = vsyncpa [#allocation4], 1 }

// kernel: tpu_custom_call.1
= control target key start
LH: loop header
LB: loop body
LE: loop exit
PB: predicated region body
PF: predicated region fallthrough
CT: control target
= control target key end

     0   :  { %8 = vsyncpa [#allocation4], 0  ;;  %s424_s0 = inlined_call_operand.hbm [shape: bf16[16,128], index: 0, kind: input, shape index: {}]   ;;  %s425_s1 = inlined_call_operand.hbm [shape: bf16[128,128], index: 1, kind: input, shape index: {}]   ;;  %s426_s2 = inlined_call_operand.vmem [shape: f32[1,128], index: 2, kind: input, shape index: {}]   ;;  %s427_s3 = inlined_call_operand.hbm [shape: bf16[16,128], index: 3, kind: output, shape index: {}]  }
   0x1   :  { %9 = vsyncpa [#allocation7], 0 }
   0x2   :  { %10 = vsyncpa [#allocation5], 0  ;;  %s349_s12 = smov [#allocation3]   ;;  %s277_s16 = scalar_lea.hbm %s424_s0, 128 }
   0x3   :  { %s16_s13 = sshll.u32 %s349_s12, 4  ;;  %p278_p0 = scmp.ne.s32.totalorder %s424_s0, %s277_s16  ;;  %s17_s13 = int_to_ptr.vmem [resolvable:$true] %s16_s13 }
   0x4   :  { %p281_p1 = scmp.lt.u32.totalorder %s277_s16, %s424_s0 }
   0x6   :  { %p283_p2 = pnand %p281_p1, %p278_p0 }
   0x8   :  { %286 = shalt.err (!%p283_p2)
}
   0x9   :  { %s287_s21 = scalar_lea.vmem %s17_s13, 128  ;;  %p292_p4 = scmp.lt.s32.totalorder %s17_s13, %s17_s13 }
   0xa   :  { %p288_p3 = scmp.ne.s32.totalorder %s17_s13, %s287_s21  ;;  %p293_p5 = scmp.lt.s32.totalorder %s287_s21, %s287_s21 }
   0xc   :  { %p294_p6 = por %p293_p5, %p292_p4 }
   0xe   :  { %p295_p7 = pnand %p294_p6, %p288_p3 }
  0x10   :  { %298 = shalt.err (!%p295_p7)
}
  0x11   :  { %s350_s22 = smov 64   ;;  %s351_s23 = smov 4  }
  0x12   :  { %22 = dma.hbm_to_vmem [thread:$0]  %s424_s0, 128, %s17_s13, [#allocation4], %s350_s22, %s350_s22, %s351_s23  }
  0x13   :  { %s352_s26 = smov [#allocation6]   ;;  %s299_s30 = scalar_lea.hbm %s425_s1, 1024 }
  0x14   :  { %s28_s27 = sshll.u32 %s352_s26, 4  ;;  %p300_p8 = scmp.ne.s32.totalorder %s425_s1, %s299_s30  ;;  %s29_s27 = int_to_ptr.vmem [resolvable:$true] %s28_s27 }
  0x15   :  { %p303_p9 = scmp.lt.u32.totalorder %s299_s30, %s425_s1 }
  0x17   :  { %p305_p10 = pnand %p303_p9, %p300_p8 }
  0x19   :  { %308 = shalt.err (!%p305_p10)
}
  0x1a   :  { %s309_s8 = scalar_lea.vmem %s29_s27, 1024  ;;  %p314_p12 = scmp.lt.s32.totalorder %s29_s27, %s29_s27 }
  0x1b   :  { %p310_p11 = scmp.ne.s32.totalorder %s29_s27, %s309_s8  ;;  %p315_p13 = scmp.lt.s32.totalorder %s309_s8, %s309_s8 }
  0x1d   :  { %p316_p0 = por %p315_p13, %p314_p12 }
  0x1f   :  { %p317_p1 = pnand %p316_p0, %p310_p11 }
  0x21   :  { %320 = shalt.err (!%p317_p1)
}
  0x22   :  { %34 = dma.hbm_to_vmem [thread:$0]  %s425_s1, 1024, %s29_s27, [#allocation7], %s350_s22, %s350_s22, %s351_s23  }
  0x23   :  { %343 = dma.done.wait [#allocation4], 128  }
  0x24   :  { %344 = vsyncadd [#allocation4], 4294967168 }
  0x25   :  { %345 = dma.done.wait [#allocation7], 1024  }
  0x26   :  { %346 = vsyncadd [#allocation7], 4294966272  ;;  %v353_v0 = vmov 0.0   ;;  %vm354_vm0 = vmmov 0   ;;  %v268_v1 = vld [vmem:[#allocation6] sm:$0xff]   ;;  %v269_v2 = vld [vmem:[#allocation6 + $0x8] sm:$0xff]  }
  0x27   :  { %241 = vmatprep.subr.bf16.mxu0 %v353_v0  ;;  %257 = vmatprep.mubr.msk.bf16.mxu0 %vm354_vm0, %v353_v0  ;;  %v270_v3 = vld [vmem:[#allocation6 + $0x10] sm:$0xff]   ;;  %v271_v4 = vld [vmem:[#allocation6 + $0x18] sm:$0xff]   ;;  %v272_v5 = vld [vmem:[#allocation6 + $0x20] sm:$0xff]   ;;  %s355_s11 = smov [#allocation8]  }
  0x28   :  { %242 = vmatpush3.bf16.msra.mxu0 %v268_v1  ;;  %v273_v6 = vld [vmem:[#allocation6 + $0x28] sm:$0xff]   ;;  %v274_v7 = vld [vmem:[#allocation6 + $0x30] sm:$0xff]   ;;  %v275_v8 = vld [vmem:[#allocation6 + $0x38] sm:$0xff]   ;;  %s200_s12 = sshll.u32 %s355_s11, 4  ;;  %s201_s12 = int_to_ptr.vmem [resolvable:$true] %s200_s12 }
  0x29   :  { %243 = vmatprep.subr.bf16.mxu0 %v353_v0  ;;  %v276_v9 = vld [vmem:[#allocation3] sm:$0xff]   ;;  %s321_s13 = scalar_lea.vmem %s201_s12, 128  ;;  %p326_p3 = scmp.lt.s32.totalorder %s201_s12, %s201_s12 }
  0x2a   :  { %v222_v10 = vld [vmem:[%s426_s2] ss:$0 sm:$0xff]  ;;  %p322_p2 = scmp.ne.s32.totalorder %s201_s12, %s321_s13  ;;  %p327_p4 = scmp.lt.s32.totalorder %s321_s13, %s321_s13 }
  0x2c   :  { %244 = vmatpush3.bf16.msra.mxu0 %v269_v2  ;;  %p328_p5 = por %p327_p4, %p326_p3 }
  0x2d   :  { %245 = vmatprep.subr.bf16.mxu0 %v353_v0 }
  0x2e   :  { %p329_p6 = pnand %p328_p5, %p322_p2 }
  0x30   :  { %246 = vmatpush3.bf16.msra.mxu0 %v270_v3 }
  0x31   :  { %247 = vmatprep.subr.bf16.mxu0 %v353_v0 }
  0x34   :  { %248 = vmatpush3.bf16.msra.mxu0 %v271_v4 }
  0x35   :  { %249 = vmatprep.subr.bf16.mxu0 %v353_v0 }
  0x38   :  { %250 = vmatpush3.bf16.msra.mxu0 %v272_v5 }
  0x39   :  { %251 = vmatprep.subr.bf16.mxu0 %v353_v0 }
  0x3c   :  { %252 = vmatpush3.bf16.msra.mxu0 %v273_v6 }
  0x3d   :  { %253 = vmatprep.subr.bf16.mxu0 %v353_v0 }
  0x40   :  { %254 = vmatpush3.bf16.msra.mxu0 %v274_v7 }
  0x41   :  { %255 = vmatprep.subr.bf16.mxu0 %v353_v0 }
  0x44   :  { %256 = vmatpush3.bf16.msra.mxu0 %v275_v8 }
  0x47   :  { %258 = vmatmul.mubr.bf16.vlgmr.msra.gmra.mrb[0].mxu0 %v276_v9 }
 0x11a   :  { %v158_v11 = vpop.f32.mrb[0].mxu0 }
 0x11b   :  { %v181_v12 = vadd.f32 %v222_v10, %v158_v11  ;;  %v259_v13 = vpop.f32.mrb[1].mxu0 }
 0x11c   :  { %v161_v14 = vpop.f32.mrb[2].mxu0 }
 0x11d   :  { %v182_v15 = vadd.f32 %v222_v10, %v161_v14  ;;  %v260_v16 = vpop.f32.mrb[3].mxu0  ;;  %v183_v17 = vmax.f32 %v181_v12, 0.0 }
 0x11f   :  { %v184_v18 = vmax.f32 %v182_v15, 0.0 }
 0x121   :  { %v230_v19 = vpack.c.bf16 %v184_v18, %v183_v17 }
 0x123   :  { %231 = vst [vmem:[#allocation8] sm:$0xff] %v230_v19  }
 0x124   :  { %332 = shalt.err (!%p329_p6)
}
 0x125   :  { %s333_s15 = scalar_lea.hbm %s427_s3, 128 }
 0x126   :  { %p334_p7 = scmp.ne.s32.totalorder %s427_s3, %s333_s15  ;;  %p337_p8 = scmp.lt.u32.totalorder %s333_s15, %s427_s3 }
 0x128   :  { %p339_p9 = pnand %p337_p8, %p334_p7 }
 0x12a   :  { %342 = shalt.err (!%p339_p9)
}
 0x12b   :  { %206 = dma.vmem_to_hbm [thread:$0]  %s201_s12, 128, %s427_s3, [#allocation5], %s350_s22, %s350_s22, %s351_s23  }
 0x12c   :  { %347 = dma.done.wait [#allocation5], 128  }
 0x12d   :  { %348 = vsyncadd [#allocation5], 4294967168 }
 0x12e   :  { %210 = vsyncpa [#allocation4], 1 }
 0x12f   :  { %211 = vsyncpa [#allocation7], 1 }
 0x130   :  { %212 = vsyncpa [#allocation5], 1 }

</bundles_post_ra>
